<compile_context>
chip_gen: v7x
topology: tpu7x:2x2x1
jax: 0.10.0
libtpu: 0.0.40
codegen_flags: <defaults>
</compile_context>

<pallas_src>
import jax
import jax.numpy as jnp
from jax.experimental import pallas as pl
from jax.experimental.pallas import tpu as pltpu

LANES = 128  # vreg lane width


def _round_up(n, m):
    return -(-n // m) * m


def lin_softmax_kernel(params_ref, x_ref, o_ref):
    # params_ref: SMEM f32[4] = [w0, w1, b0, b1]
    # x_ref:      VMEM (TB, 128) lane-dense slab of scalar features
    # o_ref:      VMEM (TB, 256): lanes [0,128) = class-0 prob, [128,256) = class-1 prob
    x = x_ref[...]
    w0 = params_ref[0]
    w1 = params_ref[1]
    b0 = params_ref[2]
    b1 = params_ref[3]

    # Linear(1, 2): plain broadcast multiply-add on the VPU (no MXU).
    l0 = x * w0 + b0
    l1 = x * w1 + b1

    # Numerically-stable 2-class softmax, fully elementwise (VPU + EUP).
    m = jnp.maximum(l0, l1)
    e0 = jnp.exp(l0 - m)
    e1 = jnp.exp(l1 - m)
    inv = 1.0 / (e0 + e1)  # exact reciprocal: kernel is HBM-bound, EUP has slack

    o_ref[:, :LANES] = (e0 * inv).astype(o_ref.dtype)
    o_ref[:, LANES:] = (e1 * inv).astype(o_ref.dtype)


def _lin_softmax_ref(x, weight, bias):
    logits = (x.astype(jnp.float32) @ weight.astype(jnp.float32).T
              + bias.astype(jnp.float32))
    return jax.nn.softmax(logits, axis=1)


def lin_forward(x, weight, bias, *, max_tile_rows=2048, min_pallas_batch=1 << 16):
    """x: (B, 1), weight: (2, 1), bias: (2,)  ->  (B, 2) softmax probabilities."""
    B = x.shape[0]

    # Tiny batches: pallas_call launch + wrapper layout passes dominate; a
    # single fused XLA elementwise op is strictly faster.
    if B < min_pallas_batch:
        return _lin_softmax_ref(x, weight, bias)

    # Lane-dense layout: flatten to (rows, 128), rows a multiple of 8 only.
    rows = _round_up(max(8, pl.cdiv(B, LANES)), 8)

    # Tiling: big tiles amortise the ~0.35 us/step overhead; force >= 2 grid
    # steps once rows >= 16 so both v7x TensorCores get work. tile_rows is
    # chosen so it divides rows exactly (waste bounded by < 8 rows per tile),
    # so every block is full and (8, 128)-aligned.
    n_tiles = max(2, pl.cdiv(rows, max_tile_rows)) if rows >= 16 else 1
    tile_rows = _round_up(pl.cdiv(rows, n_tiles), 8)
    rows = n_tiles * tile_rows
    b_pad = rows * LANES

    xf = x.reshape(-1)
    if xf.dtype != jnp.float32:
        xf = xf.astype(jnp.float32)
    if b_pad != B:
        xf = jnp.pad(xf, (0, b_pad - B))  # skipped entirely for aligned B
    x2d = xf.reshape(rows, LANES)

    # The 4 scalar parameters live in SMEM: [w0, w1, b0, b1].
    params = jnp.concatenate(
        [weight.reshape(-1).astype(jnp.float32),
         bias.reshape(-1).astype(jnp.float32)])

    out = pl.pallas_call(
        lin_softmax_kernel,
        out_shape=jax.ShapeDtypeStruct((rows, 2 * LANES), jnp.float32),
        grid=(n_tiles,),
        in_specs=[
            pl.BlockSpec(memory_space=pltpu.MemorySpace.SMEM),       # params
            pl.BlockSpec((tile_rows, LANES), lambda i: (i, 0)),       # x slab
        ],
        out_specs=pl.BlockSpec((tile_rows, 2 * LANES), lambda i: (i, 0)),
        compiler_params=pltpu.CompilerParams(
            dimension_semantics=("parallel",),      # megacore / v7x 2-TC sharding
            vmem_limit_bytes=32 * 1024 * 1024,      # safe on v7x's 64 MiB VMEM
        ),
    )(params, x2d)

    # (rows, 256) -> (B, 2): one interleave pass in XLA (f32 output preserved
    # for module semantics).
    # TODO(synk): packing (p0, p1) as 2xbf16 into one u32 lane would also drop
    # this interleave pass, but changes the output dtype to bf16.
    p0 = out[:, :LANES].reshape(b_pad)[:B]
    p1 = out[:, LANES:].reshape(b_pad)[:B]
    return jnp.stack([p0, p1], axis=1)


if __name__ == "__main__":
    key = jax.random.PRNGKey(0)
    k_x, k_w, k_b = jax.random.split(key, 3)

    # Deterministic PyTorch-like init (uniform(-1/sqrt(in), 1/sqrt(in)), in=1)
    weight = jax.random.uniform(k_w, (2, 1), jnp.float32, minval=-1.0, maxval=1.0)
    bias = jax.random.uniform(k_b, (2,), jnp.float32, minval=-1.0, maxval=1.0)

    # Small batch of scalar features, shape (B, 1)
    B = 200
    x = jax.random.normal(k_x, (B, 1), jnp.float32)

    ref = _lin_softmax_ref(x, weight, bias)

    # Force the Pallas path (small B would otherwise take the jnp fallback).
    out = lin_forward(x, weight, bias, min_pallas_batch=0)
    out = jax.block_until_ready(out)
    assert out.shape == (B, 2)
    # Exact reciprocal now -> normal f32 tolerance.
    assert jnp.allclose(out, ref, atol=1e-5, rtol=1e-5), "Pallas path mismatch"

    # Also sanity-check the small-batch fallback path.
    out_fb = jax.block_until_ready(lin_forward(x, weight, bias))
    assert jnp.allclose(out_fb, ref, atol=1e-6, rtol=1e-6), "fallback mismatch"

    print("KERNEL_OK")
</pallas_src>

<mosaic_0001>
module attributes {stable_mosaic.version = 11 : i64} {
  func.func @lin_softmax_kernel(%arg0: i32, %arg1: memref<4xf32, #tpu.memory_space<smem>>, %arg2: memref<8x128xf32, #tpu.memory_space<vmem>>, %arg3: memref<8x256xf32, #tpu.memory_space<vmem>>) attributes {dimension_semantics = [#tpu.dimension_semantics<parallel>], iteration_bounds = array<i64: 1>, scalar_prefetch = 0 : i64, scratch_operands = 0 : i64, tpu.core_type = #tpu.core_type<tc>, window_params = [{transform_indices = @transform_0, window_bounds = array<i64: 4>}, {transform_indices = @transform_1, window_bounds = array<i64: 8, 128>}, {transform_indices = @transform_2, window_bounds = array<i64: 8, 256>}]} {
    %c0 = arith.constant 0 : index
    %c0_0 = arith.constant 0 : index
    %0 = vector.load %arg2[%c0, %c0_0] : memref<8x128xf32, #tpu.memory_space<vmem>>, vector<8x128xf32>
    %c0_1 = arith.constant 0 : index
    %1 = memref.load %arg1[%c0_1] : memref<4xf32, #tpu.memory_space<smem>>
    %c1 = arith.constant 1 : index
    %2 = memref.load %arg1[%c1] : memref<4xf32, #tpu.memory_space<smem>>
    %c2 = arith.constant 2 : index
    %3 = memref.load %arg1[%c2] : memref<4xf32, #tpu.memory_space<smem>>
    %c3 = arith.constant 3 : index
    %4 = memref.load %arg1[%c3] : memref<4xf32, #tpu.memory_space<smem>>
    %5 = vector.broadcast %1 : f32 to vector<8x128xf32>
    %6 = arith.mulf %0, %5 : vector<8x128xf32>
    %7 = vector.broadcast %3 : f32 to vector<8x128xf32>
    %8 = arith.addf %6, %7 : vector<8x128xf32>
    %9 = vector.broadcast %2 : f32 to vector<8x128xf32>
    %10 = arith.mulf %0, %9 : vector<8x128xf32>
    %11 = vector.broadcast %4 : f32 to vector<8x128xf32>
    %12 = arith.addf %10, %11 : vector<8x128xf32>
    %13 = arith.maximumf %8, %12 : vector<8x128xf32>
    %14 = arith.subf %8, %13 : vector<8x128xf32>
    %15 = math.exp %14 : vector<8x128xf32>
    %16 = arith.subf %12, %13 : vector<8x128xf32>
    %17 = math.exp %16 : vector<8x128xf32>
    %18 = arith.addf %15, %17 : vector<8x128xf32>
    %cst = arith.constant 1.000000e+00 : f32
    %19 = vector.broadcast %cst : f32 to vector<8x128xf32>
    %20 = arith.divf %19, %18 : vector<8x128xf32>
    %21 = arith.mulf %15, %20 : vector<8x128xf32>
    %c0_2 = arith.constant 0 : index
    %c0_3 = arith.constant 0 : index
    %22 = vector.load %arg3[%c0_2, %c0_3] : memref<8x256xf32, #tpu.memory_space<vmem>>, vector<8x128xf32>
    tpu.vector_store %arg3[%c0_2, %c0_3], %21 {strides = array<i32>} : memref<8x256xf32, #tpu.memory_space<vmem>>, vector<8x128xf32>,
    %23 = arith.mulf %17, %20 : vector<8x128xf32>
    %c0_4 = arith.constant 0 : index
    %c128 = arith.constant 128 : index
    %24 = vector.load %arg3[%c0_4, %c128] : memref<8x256xf32, #tpu.memory_space<vmem>>, vector<8x128xf32>
    tpu.vector_store %arg3[%c0_4, %c128], %23 {strides = array<i32>} : memref<8x256xf32, #tpu.memory_space<vmem>>, vector<8x128xf32>,
    return
  }
  func.func @transform_0(%arg0: i32) -> i32 {
    %c0_i32 = arith.constant 0 : i32
    %c0_i32_0 = arith.constant 0 : i32
    return %c0_i32 : i32
  }
  func.func @transform_1(%arg0: i32) -> (i32, i32) {
    %c0_i32 = arith.constant 0 : i32
    %c0_i32_0 = arith.constant 0 : i32
    return %arg0, %c0_i32 : i32, i32
  }
  func.func @transform_2(%arg0: i32) -> (i32, i32) {
    %c0_i32 = arith.constant 0 : i32
    %c0_i32_0 = arith.constant 0 : i32
    return %arg0, %c0_i32 : i32, i32
  }
}

</mosaic_0001>

<bundles_post_ra>
// kernel: tpu_custom_call.1
= control target key start
LH: loop header
LB: loop body
LE: loop exit
PB: predicated region body
PF: predicated region fallthrough
CT: control target
= control target key end

     0   :  { %7 = vsyncpa [#allocation5], 0  ;;  %s204_s0 = inlined_call_operand.hbm [shape: f32[4], index: 0, kind: input, shape index: {}]   ;;  %s205_s1 = inlined_call_operand.hbm [shape: f32[8,128], index: 1, kind: input, shape index: {}]   ;;  %s206_s2 = inlined_call_operand.hbm [shape: f32[8,256], index: 2, kind: output, shape index: {}]  }
   0x1   :  { %8 = vsyncpa [#allocation3], 0 }
   0x2   :  { %9 = vsyncpa [#allocation4], 0  ;;  %s90_s11 = scalar_lea.hbm %s204_s0, 16 }
   0x3   :  { %p91_p0 = scmp.ne.s32.totalorder %s204_s0, %s90_s11  ;;  %p94_p1 = scmp.lt.u32.totalorder %s90_s11, %s204_s0 }
   0x5   :  { %p96_p2 = pnand %p94_p1, %p91_p0 }
   0x7   :  { %99 = shalt.err (!%p96_p2)
}
   0x8   :  { %s150_s16 = smov [#allocation2]   ;;  %s151_s19 = smov [#allocation6]  }
   0x9   :  { %17 = dma.hbm_to_smem %s204_s0, 16, %s150_s16, [#allocation5]  }
   0xa   :  { %s24_s20 = sshll.u32 %s151_s19, 4  ;;  %s100_s23 = scalar_lea.hbm %s205_s1, 128  ;;  %s25_s20 = int_to_ptr.vmem [resolvable:$true] %s24_s20 }
   0xb   :  { %p101_p3 = scmp.ne.s32.totalorder %s205_s1, %s100_s23  ;;  %p104_p4 = scmp.lt.u32.totalorder %s100_s23, %s205_s1 }
   0xd   :  { %p106_p5 = pnand %p104_p4, %p101_p3 }
   0xf   :  { %109 = shalt.err (!%p106_p5)
}
  0x10   :  { %s110_s28 = scalar_lea.vmem %s25_s20, 128  ;;  %p115_p7 = scmp.lt.s32.totalorder %s25_s20, %s25_s20 }
  0x11   :  { %p111_p6 = scmp.ne.s32.totalorder %s25_s20, %s110_s28  ;;  %p116_p8 = scmp.lt.s32.totalorder %s110_s28, %s110_s28 }
  0x13   :  { %p117_p9 = por %p116_p8, %p115_p7 }
  0x15   :  { %p118_p10 = pnand %p117_p9, %p111_p6 }
  0x17   :  { %121 = shalt.err (!%p118_p10)
}
  0x18   :  { %27 = dma.hbm_to_vmem [thread:$0]  %s205_s1, 128, %s25_s20, [#allocation3]  }
  0x19   :  { %144 = dma.done.wait [#allocation5], 16  }
  0x1a   :  { %145 = vsyncadd [#allocation5], 4294967280 }
  0x1b   :  { %146 = dma.done.wait [#allocation3], 128  }
  0x1c   :  { %147 = vsyncadd [#allocation3], 4294967168 }
  0x1d   :  { %34 = sfence }
  0x1e   :  { %s36_s30 = sld [smem:[#allocation2]]  ;;  %s78_s3 = sld [smem:[#allocation2 + $0x1]]  ;;  %v35_v0 = vld [vmem:[#allocation6] sm:$0xff] }
  0x1f   :  { %s79_s4 = sld [smem:[#allocation2 + $0x2]]  ;;  %s80_s5 = sld [smem:[#allocation2 + $0x3]] }
  0x20   :  { %s152_s1 = smov [#allocation7]  }
  0x21   :  { %s68_s6 = sshll.u32 %s152_s1, 4  ;;  %s69_s6 = int_to_ptr.vmem [resolvable:$true] %s68_s6 }
  0x22   :  { %s122_s7 = scalar_lea.vmem %s69_s6, 256  ;;  %p127_p12 = scmp.lt.s32.totalorder %s69_s6, %s69_s6 }
  0x23   :  { %p123_p11 = scmp.ne.s32.totalorder %s69_s6, %s122_s7  ;;  %p128_p13 = scmp.lt.s32.totalorder %s122_s7, %s122_s7 }
  0x24   :  { %v40_v1 = vstv %s36_s30  ;;  %v44_v2 = vstv %s78_s3 }
  0x25   :  { %v41_v3 = vmul.f32 %v40_v1, %v35_v0  ;;  %v42_v4 = vstv %s79_s4  ;;  %v45_v5 = vmul.f32 %v44_v2, %v35_v0  ;;  %v46_v6 = vstv %s80_s5  ;;  %p129_p0 = por %p128_p13, %p127_p12 }
  0x27   :  { %v43_v7 = vadd.f32 %v42_v4, %v41_v3  ;;  %v47_v8 = vadd.f32 %v46_v6, %v45_v5  ;;  %p130_p1 = pnand %p129_p0, %p123_p11 }
  0x29   :  { %v48_v9 = vmax.f32 %v43_v7, %v47_v8 }
  0x2b   :  { %v49_v10 = vsub.f32 %v43_v7, %v48_v9  ;;  %v52_v11 = vsub.f32 %v47_v8, %v48_v9 }
  0x2d   :  { %v50_v12 = vmul.f32 1.442695, %v49_v10  ;;  %v53_v13 = vmul.f32 1.442695, %v52_v11 }
  0x2f   :  { %84 = vpow2.f32 %v50_v12 }
  0x30   :  { %86 = vpow2.f32 %v53_v13 }
  0x39   :  { %v85_v14 = vpop.eup %84 }
  0x3a   :  { %v87_v15 = vpop.eup %86 }
  0x3b   :  { %v55_v16 = vadd.f32 %v87_v15, %v85_v14 }
  0x3d   :  { %88 = vrcp.f32 %v55_v16 }
  0x47   :  { %v89_v17 = vpop.eup %88 }
  0x48   :  { %v58_v18 = vmul.f32 %v89_v17, %v85_v14  ;;  %v60_v19 = vmul.f32 %v89_v17, %v87_v15 }
  0x4a   :  { %59 = vst [vmem:[#allocation7] sm:$0xff] %v58_v18  ;;  %61 = vst [vmem:[#allocation7 + $0x8] sm:$0xff] %v60_v19 }
  0x4b   :  { %133 = shalt.err (!%p130_p1)
}
  0x4c   :  { %s134_s10 = scalar_lea.hbm %s206_s2, 256 }
  0x4d   :  { %p135_p2 = scmp.ne.s32.totalorder %s206_s2, %s134_s10  ;;  %p138_p3 = scmp.lt.u32.totalorder %s134_s10, %s206_s2 }
  0x4f   :  { %p140_p4 = pnand %p138_p3, %p135_p2 }
  0x51   :  { %143 = shalt.err (!%p140_p4)
}
  0x52   :  { %71 = dma.vmem_to_hbm [thread:$0]  %s69_s6, 256, %s206_s2, [#allocation4]  }
  0x53   :  { %148 = dma.done.wait [#allocation4], 256  }
  0x54   :  { %149 = vsyncadd [#allocation4], 4294967040 }
  0x55   :  { %75 = vsyncpa [#allocation3], 1 }
  0x56   :  { %76 = vsyncpa [#allocation4], 1 }
  0x57   :  { %77 = vsyncpa [#allocation5], 1 }

</bundles_post_ra>
